<compile_context>
chip_gen: v6e
topology: v6e:2x2x1
jax: 0.10.0
libtpu: 0.0.40
codegen_flags: <defaults>
</compile_context>

<pallas_src>
import math

import jax
import jax.numpy as jnp
import numpy as np
from jax.experimental import pallas as pl
from jax.experimental.pallas import tpu as pltpu

_TWO_PI = 2.0 * math.pi


def _posemb_kernel(x_ref, w_ref, o_ref):
    # x_ref: (tb, 1)        timesteps for this row-tile
    # w_ref: (1, out_dim)   [0, 2*pi*w, 2*pi*w]   (column 0 is a dummy zero)
    # o_ref: (tb, out_dim)  out_dim = 1 + 2*half
    tb, out_dim = o_ref.shape
    half = (out_dim - 1) // 2

    x = x_ref[...]                                   # (tb, 1)       f32
    wf = w_ref[...]                                  # (1, out_dim)  f32
    phase = x * wf                                   # (tb, out_dim) VPU broadcast mul
    s = jnp.sin(phase)                               # EUP
    c = jnp.cos(phase)                               # EUP

    col = jax.lax.broadcasted_iota(jnp.int32, (tb, out_dim), 1)
    out = jnp.where(col == 0, x, jnp.where(col <= half, s, c))
    o_ref[...] = out.astype(o_ref.dtype)             # single lane-dense store


def random_or_learned_sinusoidal_pos_emb(x, weights):
    """x: (B,) f32 timesteps; weights: (half_dim,) f32  ->  (B, 2*half_dim + 1)."""
    B = x.shape[0]
    half = weights.shape[0]
    out_dim = 2 * half + 1

    x2 = x.reshape(B, 1).astype(jnp.float32)

    # One-time parameter layout transform (fold 2*pi, duplicate for sin/cos lanes,
    # prepend a dummy zero for the raw-x column).
    w_scaled = weights.astype(jnp.float32) * _TWO_PI
    w_full = jnp.concatenate(
        [jnp.zeros((1,), jnp.float32), w_scaled, w_scaled]
    ).reshape(1, out_dim)

    # Row tile: whole batch if small, otherwise 1024-row tiles (multiple of 8 so the
    # (8, 128) block constraint holds; a ragged last tile is masked by Pallas).
    tb = B if B <= 1024 else 1024
    grid = (pl.cdiv(B, tb),)

    return pl.pallas_call(
        _posemb_kernel,
        out_shape=jax.ShapeDtypeStruct((B, out_dim), jnp.float32),
        grid=grid,
        in_specs=[
            pl.BlockSpec((tb, 1), lambda i: (i, 0)),        # x row-tile
            pl.BlockSpec((1, out_dim), lambda i: (0, 0)),   # weights row (resident)
        ],
        out_specs=pl.BlockSpec((tb, out_dim), lambda i: (i, 0)),
        compiler_params=pltpu.CompilerParams(
            dimension_semantics=("parallel",),
        ),
    )(x2, w_full)


def posemb_reference(x, weights):
    # Pure-JAX reference mirroring the PyTorch module exactly.
    xb = x[:, None]
    freqs = xb * weights[None, :] * _TWO_PI
    return jnp.concatenate([xb, jnp.sin(freqs), jnp.cos(freqs)], axis=-1)


if __name__ == "__main__":
    B = 8          # batch of diffusion timesteps
    dim = 32       # module's `dim` (must be even) -> half_dim = 16, output dim = 33
    half = dim // 2

    key = jax.random.PRNGKey(0)
    kx, kw = jax.random.split(key)
    x = jax.random.uniform(kx, (B,), dtype=jnp.float32)            # t in [0, 1)
    weights = jax.random.normal(kw, (half,), dtype=jnp.float32)    # nn.Parameter(randn(half_dim))
    # (is_random only toggles requires_grad in PyTorch; forward math is identical.)

    out = random_or_learned_sinusoidal_pos_emb(x, weights)
    out = jax.block_until_ready(out)

    ref = posemb_reference(x, weights)
    np.testing.assert_allclose(np.asarray(out), np.asarray(ref), rtol=1e-5, atol=1e-5)

    print("KERNEL_OK")
</pallas_src>

<mosaic_0001>
module attributes {stable_mosaic.version = 11 : i64} {
  func.func @_posemb_kernel(%arg0: i32, %arg1: memref<8x1xf32, #tpu.memory_space<vmem>>, %arg2: memref<1x33xf32, #tpu.memory_space<vmem>>, %arg3: memref<8x33xf32, #tpu.memory_space<vmem>>) attributes {dimension_semantics = [#tpu.dimension_semantics<parallel>], iteration_bounds = array<i64: 1>, scalar_prefetch = 0 : i64, scratch_operands = 0 : i64, tpu.core_type = #tpu.core_type<tc>, window_params = [{transform_indices = @transform_0, window_bounds = array<i64: 8, 1>}, {pipeline_mode = #tpu.pipeline_mode<synchronous>, transform_indices = @transform_1, window_bounds = array<i64: 1, 33>}, {transform_indices = @transform_2, window_bounds = array<i64: 8, 33>}]} {
    %c0 = arith.constant 0 : index
    %c0_0 = arith.constant 0 : index
    %0 = vector.load %arg1[%c0, %c0_0] : memref<8x1xf32, #tpu.memory_space<vmem>>, vector<8x1xf32>
    %c0_1 = arith.constant 0 : index
    %c0_2 = arith.constant 0 : index
    %1 = vector.load %arg2[%c0_1, %c0_2] : memref<1x33xf32, #tpu.memory_space<vmem>>, vector<1x33xf32>
    %2 = vector.broadcast %0 : vector<8x1xf32> to vector<8x33xf32>
    %3 = vector.broadcast %1 : vector<1x33xf32> to vector<8x33xf32>
    %4 = arith.mulf %2, %3 : vector<8x33xf32>
    %5 = math.sin %4 : vector<8x33xf32>
    %6 = math.cos %4 : vector<8x33xf32>
    %7 = tpu.iota {dimensions = array<i32: 1>} : vector<8x33xi32>
    %c0_i32 = arith.constant 0 : i32
    %8 = vector.broadcast %c0_i32 : i32 to vector<8x33xi32>
    %9 = arith.cmpi eq, %7, %8 : vector<8x33xi32>
    %c16_i32 = arith.constant 16 : i32
    %10 = vector.broadcast %c16_i32 : i32 to vector<8x33xi32>
    %11 = arith.cmpi sle, %7, %10 : vector<8x33xi32>
    %12 = arith.select %11, %5, %6 : vector<8x33xi1>, vector<8x33xf32>
    %13 = vector.shape_cast %0 : vector<8x1xf32> to vector<8x1xf32>
    %14 = vector.broadcast %13 : vector<8x1xf32> to vector<8x33xf32>
    %15 = arith.select %9, %14, %12 : vector<8x33xi1>, vector<8x33xf32>
    %c0_3 = arith.constant 0 : index
    %c0_4 = arith.constant 0 : index
    %16 = vector.load %arg3[%c0_3, %c0_4] : memref<8x33xf32, #tpu.memory_space<vmem>>, vector<8x33xf32>
    tpu.vector_store %arg3[%c0_3, %c0_4], %15 {strides = array<i32>} : memref<8x33xf32, #tpu.memory_space<vmem>>, vector<8x33xf32>,
    return
  }
  func.func @transform_0(%arg0: i32) -> (i32, i32) {
    %c0_i32 = arith.constant 0 : i32
    %c0_i32_0 = arith.constant 0 : i32
    return %arg0, %c0_i32 : i32, i32
  }
  func.func @transform_1(%arg0: i32) -> (i32, i32) {
    %c0_i32 = arith.constant 0 : i32
    %c0_i32_0 = arith.constant 0 : i32
    %c0_i32_1 = arith.constant 0 : i32
    return %c0_i32, %c0_i32_0 : i32, i32
  }
  func.func @transform_2(%arg0: i32) -> (i32, i32) {
    %c0_i32 = arith.constant 0 : i32
    %c0_i32_0 = arith.constant 0 : i32
    return %arg0, %c0_i32 : i32, i32
  }
}

</mosaic_0001>

<bundles_post_ra>
// kernel: tpu_custom_call.1
= control target key start
LH: loop header
LB: loop body
LE: loop exit
PB: predicated region body
PF: predicated region fallthrough
CT: control target
= control target key end

     0   :  { %v303_v1 = vmov 0   ;;  %s361_s0 = inlined_call_operand.vmem [shape: f32[8,1], index: 0, kind: input, shape index: {}]   ;;  %s362_s1 = inlined_call_operand.vmem [shape: f32[1,33], index: 1, kind: input, shape index: {}]   ;;  %s363_s2 = inlined_call_operand.hbm [shape: f32[8,33], index: 2, kind: output, shape index: {}]  }
   0x1   :  { %v12_v0 = vld [vmem:[%s361_s0] sm:$0xff]  ;;  %276 = vset.pattern.permute.xlu0 %v303_v1 }
   0x2   :  { %16 = vperm.xlu0 %276, %v12_v0  }
   0x3   :  { %7 = vsyncpa [#allocation3], 0  ;;  %v255_v2 = vld [vmem:[%s362_s1] ss:$0 sm:$0xff]  ;;  %v304_v15 = vmov 683565275  }
   0x4   :  { %v305_v17 = vmov 2475754826   ;;  %v306_v20 = vmov 2131351028   ;;  %v307_v23 = vmov 2102212464  }
   0x5   :  { %v308_v26 = vmov 920167782   ;;  %v309_v29 = vmov 1326507024   ;;  %s310_s0 = smov [#allocation2]  }
   0x6   :  { %s247_s1 = sshll.u32 %s310_s0, 4  ;;  %s248_s1 = int_to_ptr.vmem [resolvable:$true] %s247_s1 }
   0x7   :  { %s281_s13 = scalar_lea.vmem %s248_s1, 128  ;;  %p286_p1 = scmp.lt.s32.totalorder %s248_s1, %s248_s1 }
   0x8   :  { %p282_p0 = scmp.ne.s32.totalorder %s248_s1, %s281_s13  ;;  %p287_p2 = scmp.lt.s32.totalorder %s281_s13, %s281_s13 }
   0xa   :  { %p288_p3 = por %p287_p2, %p286_p1 }
   0xc   :  { %p289_p4 = pnand %p288_p3, %p282_p0 }
  0x7d   :  { %v332_v3 = vpop.permute.xlu0 %16 }
  0x7e   :  { %v335_v4 = vmul.f32 %v255_v2, %v332_v3 }
  0x80   :  { %v29_v5 = vand.u32 2139095040, %v335_v4  ;;  %v26_v9 = vand.u32 2147483647, %v335_v4  ;;  %vm28_vm7 = vcmp.lt.s32.totalorder %v335_v4, 0 }
  0x82   :  { %v30_v6 = vshrl.u32 %v29_v5, 23  ;;  %v33_v12 = vand.u32 8388607, %v26_v9  ;;  %vm27_vm8 = vcmp.le.f32.partialorder %v26_v9, 0.7853982 }
  0x84   :  { %v256_v7 = vadd.s32 4294967169, %v30_v6  ;;  %v34_v31 = vor.u32 8388608, %v33_v12 }
  0x86   :  { %v36_v8 = vadd.s32 1, %v256_v7  ;;  %v74_v45 = vshll.u32 %v34_v31, 8 }
  0x88   :  { %vm37_vm0 = vcmp.gt.s32.totalorder %v36_v8, 0 }
  0x89   :  { %v38_v10 = vsel %vm37_vm0, %v36_v8, 0 }
  0x8a   :  { %v40_v11 = vand.u32 31, %v38_v10  ;;  %v39_v14 = vshrl.u32 %v38_v10, 5 }
  0x8c   :  { %v41_v13 = vsub.s32 32, %v40_v11  ;;  %v43_v16 = vshll.u32 %v304_v15, %v40_v11  ;;  %v46_v18 = vshll.u32 %v305_v17, %v40_v11  ;;  %v49_v22 = vshll.u32 %v306_v20, %v40_v11 }
  0x8d   :  { %v52_v25 = vshll.u32 %v307_v23, %v40_v11  ;;  %v55_v28 = vshll.u32 %v308_v26, %v40_v11  ;;  %vm58_vm1 = vcmp.lt.s32.totalorder %v39_v14, 1  ;;  %vm61_vm2 = vcmp.lt.s32.totalorder %v39_v14, 4 }
  0x8e   :  { %v44_v19 = vshrl.u32 %v305_v17, %v41_v13  ;;  %v47_v21 = vshrl.u32 %v306_v20, %v41_v13  ;;  %v50_v24 = vshrl.u32 %v307_v23, %v41_v13  ;;  %v53_v27 = vshrl.u32 %v308_v26, %v41_v13 }
  0x8f   :  { %v56_v30 = vshrl.u32 %v309_v29, %v41_v13  ;;  %v42_v40 = vshrl.u32 %v304_v15, %v41_v13  ;;  %vm60_vm3 = vcmp.lt.s32.totalorder %v39_v14, 3  ;;  %vm59_vm4 = vcmp.lt.s32.totalorder %v39_v14, 2 }
  0x90   :  { %v45_v32 = vor.u32 %v44_v19, %v43_v16  ;;  %v48_v33 = vor.u32 %v47_v21, %v46_v18  ;;  %v51_v34 = vor.u32 %v50_v24, %v49_v22  ;;  %v54_v35 = vor.u32 %v53_v27, %v52_v25 }
  0x91   :  { %v57_v36 = vor.u32 %v56_v30, %v55_v28  ;;  %v233_v25 = vlaneseq }
  0x92   :  { %v63_v37 = vsel %vm61_vm2, %v51_v34, 2102212464  ;;  %v66_v38 = vsel %vm58_vm1, %v45_v32, %v48_v33  ;;  %v70_v39 = vsel %vm58_vm1, %v48_v33, %v51_v34  ;;  %v67_v41 = vsel %vm61_vm2, %v54_v35, 920167782 }
  0x93   :  { %v71_v42 = vsel %vm61_vm2, %v57_v36, 1326507024  ;;  %v68_v43 = vsel %vm60_vm3, %v51_v34, %v67_v41  ;;  %v62_v46 = vsel %vm58_vm1, %v42_v40, %v45_v32  ;;  %v64_v47 = vsel %vm60_vm3, %v48_v33, %v63_v37 }
  0x94   :  { %v72_v44 = vsel %vm60_vm3, %v54_v35, %v71_v42  ;;  %v69_v48 = vsel %vm59_vm4, %v66_v38, %v68_v43  ;;  %v65_v54 = vsel %vm59_vm4, %v62_v46, %v64_v47  ;;  %v234_v27 = vand.u32 127, %v233_v25 }
  0x95   :  { %v73_v49 = vsel %vm59_vm4, %v70_v39, %v72_v44  ;;  %v344_v52 = vmul.u32.u64.low %v74_v45, %v69_v48  ;;  %v345_v53 = vmul.u32.u64.high %v74_v45, %v69_v48, %v344_v52  ;;  %v81_v56 = vmul.u32 %v74_v45, %v65_v54 }
  0x96   :  { %v341_v50 = vmul.u32.u64.low %v74_v45, %v73_v49  ;;  %v342_v51 = vmul.u32.u64.high %v74_v45, %v73_v49, %v341_v50  ;;  %vm236_vm9 = vcmp.le.s32.totalorder %v234_v27, 16  ;;  %vm235_vm0 = vcmp.eq.s32.totalorder %v234_v27, 0 }
  0x97   :  { %v84_v55 = vadd.s32 1, %v345_v53  ;;  %vm118_vm1 = vweird.f32 %v335_v4  ;;  %vm239_vm2 = vcmask 269312  }
  0x98   :  { %vm83_vm5 = vc.u32 %v342_v51, %v344_v52  ;;  %v82_v6 = vadd.s32 %v344_v52, %v342_v51 }
  0x99   :  { %v85_v57 = vsel %vm83_vm5, %v84_v55, %v345_v53 }
  0x9a   :  { %v86_v58 = vadd.s32 %v85_v57, %v81_v56 }
  0x9c   :  { %v87_v59 = vadd.s32 536870912, %v86_v58 }
  0x9e   :  { %v88_v60 = vshrl.u32 %v87_v59, 30 }
  0xa0   :  { %v89_v61 = vshll.u32 %v88_v60, 30  ;;  %v112_v20 = vsub.s32 4, %v88_v60 }
  0xa2   :  { %v90_v62 = vsub.s32 %v86_v58, %v89_v61  ;;  %v113_v23 = vsel %vm28_vm7, %v112_v20, %v88_v60 }
  0xa3   :  { %v115_v24 = vsel %vm27_vm8, 0, %v113_v23 }
  0xa4   :  { %v92_v63 = vsub.s32 0, %v90_v62  ;;  %v119_v26 = vadd.s32 3, %v115_v24  ;;  %v223_v29 = vand.u32 3, %v115_v24 }
  0xa6   :  { %v257_v0 = vmin.u32 %v92_v63, %v90_v62  ;;  %v120_v28 = vand.u32 3, %v119_v26  ;;  %vm228_vm11 = vcmp.eq.s32.totalorder %v223_v29, 2  ;;  %vm225_vm13 = vcmp.eq.s32.totalorder %v223_v29, 0 }
  0xa7   :  { %vm224_vm15 = vcmp.lt.s32.totalorder %v223_v29, 2 }
  0xa8   :  { %v94_v1 = vclz %v257_v0  ;;  %vm125_vm10 = vcmp.eq.s32.totalorder %v120_v28, 2  ;;  %vm122_vm12 = vcmp.eq.s32.totalorder %v120_v28, 0  ;;  %vm121_vm14 = vcmp.lt.s32.totalorder %v120_v28, 2 }
  0xaa   :  { %v258_v2 = vadd.s32 4294967294, %v94_v1 }
  0xac   :  { %vm259_vm6 = vcmp.lt.s32.totalorder %v258_v2, 0 }
  0xad   :  { %v97_v5 = vsel %vm259_vm6, 0, %v258_v2 }
  0xae   :  { %v98_v7 = vsub.s32 32, %v97_v5  ;;  %v102_v8 = vsub.s32 4294967266, %v97_v5  ;;  %v99_v10 = vshll.u32 %v90_v62, %v97_v5 }
  0xb0   :  { %v100_v11 = vshrl.u32 %v82_v6, %v98_v7  ;;  %v103_v12 = vadd.s32 127, %v102_v8 }
  0xb2   :  { %v101_v13 = vor.u32 %v100_v11, %v99_v10  ;;  %v104_v14 = vshll.u32 %v103_v12, 23 }
  0xb4   :  { %v105_v15 = vor.u32 4788187, %v104_v14  ;;  %v108_v17 = vcvt.s32.f32 %v101_v13 }
  0xb6   :  { %v106_v16 = vand.u32 2147483647, %v105_v15 }
  0xb8   :  { %v109_v18 = vmul.f32 %v108_v17, %v106_v16 }
  0xba   :  { %v110_v19 = vxor.u32 2147483648, %v109_v18 }
  0xbc   :  { %v111_v21 = vsel %vm28_vm7, %v110_v19, %v109_v18 }
  0xbd   :  { %v114_v22 = vsel %vm27_vm8, %v335_v4, %v111_v21 }
  0xbe   :  { %277 = vcosq.f32 %v114_v22 }
  0xbf   :  { %279 = vsinq.f32 %v114_v22 }
  0xcb   :  { %v278_v30 = vpop.eup %277 }
  0xcc   :  { %v280_v31 = vpop.eup %279  ;;  %v126_v32 = vxor.u32 2147483648, %v278_v30 }
  0xcd   :  { %v123_v33 = vxor.u32 2147483648, %v280_v31 }
  0xce   :  { %v127_v9 = vsel %vm125_vm10, %v126_v32, %v280_v31  ;;  %v230_v34 = vsel %vm228_vm11, %v126_v32, %v280_v31 }
  0xcf   :  { %v124_v35 = vsel %vm122_vm12, %v278_v30, %v123_v33  ;;  %v227_v36 = vsel %vm225_vm13, %v278_v30, %v123_v33 }
  0xd0   :  { %v128_v37 = vsel %vm121_vm14, %v124_v35, %v127_v9  ;;  %v231_v38 = vsel %vm224_vm15, %v227_v36, %v230_v34 }
  0xd1   :  { %v129_v39 = vsel %vm118_vm1, nan, %v128_v37  ;;  %v232_v40 = vsel %vm118_vm1, nan, %v231_v38 }
  0xd2   :  { %v237_v41 = vsel %vm236_vm9, %v129_v39, %v232_v40 }
  0xd3   :  { %v238_v42 = vsel %vm235_vm0, %v332_v3, %v237_v41 }
  0xd4   :  { %240 = vst.msk [vmem:[#allocation2] sm:$0xff] %vm239_vm2, %v238_v42 }
  0xd5   :  { %292 = shalt.err (!%p289_p4)
}
  0xd6   :  { %250 = dma.vmem_to_hbm [thread:$0]  %s248_s1, 128, %s363_s2, [#allocation3]  }
  0xd7   :  { %301 = dma.done.wait [#allocation3], 128  }
  0xd8   :  { %302 = vsyncadd [#allocation3], 4294967168 }
  0xd9   :  { %254 = vsyncpa [#allocation3], 1 }

</bundles_post_ra>
